<compile_context>
chip_gen: v7x
topology: tpu7x:2x2x1
jax: 0.10.0
libtpu: 0.0.40
codegen_flags: <defaults>
</compile_context>

<pallas_src>
import functools

import jax
import jax.numpy as jnp
from jax import lax
from jax.experimental import pallas as pl
from jax.experimental.pallas import tpu as pltpu


def _round_up(x, m):
    return ((x + m - 1) // m) * m


# ----------------------------------------------------------------------------
# Path 1: VMEM-resident table, one-hot MXU gather (small vocabs).
# ----------------------------------------------------------------------------
def _onehot_gather_kernel(ids_ref, table_ref, out_ref):
    """out[r] = table[ids[r]] via a (TN, V) x (V, Dp) MXU matmul.

    ids_ref:   (TN, 1) int32 VMEM block of token ids for this tile
    table_ref: (V, Dp)  VMEM-resident table (same block index every step)
    out_ref:   (TN, Dp) lane-dense VMEM output block
    """
    tn = out_ref.shape[0]
    v = table_ref.shape[0]
    ids = ids_ref[...]  # (TN, 1)
    onehot = (ids == lax.broadcasted_iota(jnp.int32, (tn, v), 1)).astype(
        table_ref.dtype
    )
    out_ref[...] = jnp.dot(
        onehot, table_ref[...], preferred_element_type=jnp.float32
    ).astype(out_ref.dtype)


def _lookup_vmem_resident(ids_flat, table, tn):
    np_ = ids_flat.shape[0]
    v, dp = table.shape
    n_tiles = np_ // tn
    itemsize = jnp.dtype(table.dtype).itemsize
    ids_col = ids_flat.reshape(np_, 1)

    # table (possibly double-buffered) + ids/out blocks (double-buffered) + headroom
    need = 2 * v * dp * itemsize + 2 * tn * dp * itemsize + 2 * tn * 4 + (2 << 20)
    vmem_limit = int(min(max(need, 16 << 20), 48 << 20))

    return pl.pallas_call(
        _onehot_gather_kernel,
        out_shape=jax.ShapeDtypeStruct((np_, dp), table.dtype),
        grid_spec=pltpu.PrefetchScalarGridSpec(
            num_scalar_prefetch=0,
            grid=(n_tiles,),
            in_specs=[
                pl.BlockSpec((tn, 1), lambda i: (i, 0)),   # ids tile
                pl.BlockSpec((v, dp), lambda i: (0, 0)),   # whole table, resident
            ],
            out_specs=pl.BlockSpec((tn, dp), lambda i: (i, 0)),
        ),
        compiler_params=pltpu.CompilerParams(
            dimension_semantics=("parallel",),             # 2x on v7x megacore
            vmem_limit_bytes=vmem_limit,
        ),
        cost_estimate=pl.CostEstimate(
            flops=2 * np_ * v * dp,
            transcendentals=0,
            bytes_accessed=v * dp * itemsize + np_ * dp * itemsize + np_ * 4,
        ),
    )(ids_col, table)


# ----------------------------------------------------------------------------
# Path 2: HBM-resident table, per-row DMA gather directly into the out block.
# ----------------------------------------------------------------------------
def _dma_gather_kernel(tn, ids_ref, table_hbm, out_ref, sem):
    """Gather `tn` table rows per grid step, landing DMAs directly in out_ref.

    ids_ref:   SMEM (Np,) int32 scalar-prefetched token ids (pre-clamped)
    table_hbm: (V, Dp) ref left in HBM (memory_space=pl.ANY)
    out_ref:   (tn, Dp) lane-dense VMEM output block (DMA landing zone)
    sem:       single shared DMA semaphore
    """
    base = pl.program_id(0) * tn

    @pl.loop(0, tn)
    def _issue(r):
        pltpu.make_async_copy(
            table_hbm.at[pl.ds(ids_ref[base + r], 1), :],
            out_ref.at[pl.ds(r, 1), :],
            sem,
        ).start()

    # Every row copy above has the same byte count, so each wait below retires
    # exactly one of them (DMA semaphores count bytes on TPU).
    @pl.loop(0, tn)
    def _drain(r):
        pltpu.make_async_copy(
            table_hbm.at[pl.ds(0, 1), :], out_ref.at[pl.ds(0, 1), :], sem
        ).wait()


def _lookup_dma_gather(ids_flat, table, tn):
    np_ = ids_flat.shape[0]
    v, dp = table.shape
    n_tiles = np_ // tn
    itemsize = jnp.dtype(table.dtype).itemsize

    # Only the (tn, dp) output block is in VMEM (double-buffered); table stays
    # in HBM.  Generous headroom, capped well under v7x's 64 MiB physical VMEM.
    need = 2 * (2 * tn * dp * itemsize + (2 << 20))
    vmem_limit = int(min(max(need, 16 << 20), 48 << 20))

    return pl.pallas_call(
        functools.partial(_dma_gather_kernel, tn),
        out_shape=jax.ShapeDtypeStruct((np_, dp), table.dtype),
        grid_spec=pltpu.PrefetchScalarGridSpec(
            num_scalar_prefetch=1,                          # ids -> SMEM
            grid=(n_tiles,),
            in_specs=[pl.BlockSpec(memory_space=pl.ANY)],   # table stays in HBM
            out_specs=pl.BlockSpec((tn, dp), lambda i, ids: (i, 0)),
            scratch_shapes=[pltpu.SemaphoreType.DMA],
        ),
        compiler_params=pltpu.CompilerParams(
            dimension_semantics=("parallel",),              # 2x on v7x megacore
            vmem_limit_bytes=vmem_limit,
        ),
        cost_estimate=pl.CostEstimate(
            flops=0,
            transcendentals=0,
            bytes_accessed=2 * np_ * dp * itemsize + np_ * 4,
        ),
    )(ids_flat, table)


# ----------------------------------------------------------------------------
# Wrapper: jnp.take(table, ids, axis=0) semantics.
# ----------------------------------------------------------------------------
def embedding_lookup(ids, table_padded, d_orig, *, tn_default=256,
                     vmem_table_budget=16 * 1024 * 1024, force_dma=False):
    """ids: (B, S) int token ids; table_padded: (V, Dp) with Dp % 128 == 0."""
    b, s = ids.shape
    v, dp = table_padded.shape
    assert dp % 128 == 0, "table must be pre-padded to a lane-dense width"
    n = b * s
    itemsize = jnp.dtype(table_padded.dtype).itemsize

    # Clamp ids (matches jnp.take clip semantics; keeps DMA gathers in-bounds).
    ids_flat = jnp.clip(ids.reshape(-1).astype(jnp.int32), 0, v - 1)

    use_vmem = (v * dp * itemsize <= vmem_table_budget) and not force_dma

    # Tile size: big tiles amortize the ~0.35us per-step overhead; keep >= 2
    # grid steps where possible so the "parallel" axis can use both v7x cores.
    tn = min(tn_default, _round_up(n, 8))
    if n > 8 and _round_up(n, tn) // tn < 2:
        tn = max(8, _round_up((n + 1) // 2, 8))
    np_ = _round_up(n, tn)
    if np_ != n:
        ids_flat = jnp.pad(ids_flat, (0, np_ - n))

    if use_vmem:
        out = _lookup_vmem_resident(ids_flat, table_padded, tn)
    else:
        out = _lookup_dma_gather(ids_flat, table_padded, tn)
    return out[:n, :d_orig].reshape(b, s, d_orig)


class SenCNNPallas:
    """Mirror of the PyTorch SenCNN module (embedding only; forward() is empty
    in the reference, so the embedding lookup is the computed part)."""

    def __init__(self, embedding_dim, num_words, num_filters, num_classes, vocab,
                 key=jax.random.PRNGKey(0)):
        self.embedding_dim = embedding_dim
        self.num_words = num_words
        # nn.Embedding default init: N(0, 1)
        self.embedding_weight = jax.random.normal(
            key, (num_words, embedding_dim), dtype=jnp.float32
        )
        # Pad the table to a lane-dense width ONCE at init (perf review: do not
        # re-pad the whole V x Dp table on every forward call).
        dp = _round_up(embedding_dim, 128)
        if dp != embedding_dim:
            self._table_padded = jnp.pad(
                self.embedding_weight, ((0, 0), (0, dp - embedding_dim))
            )
        else:
            self._table_padded = self.embedding_weight
        # num_filters / num_classes / vocab accepted for signature parity but
        # unused — no other layers exist in the reference module.
        self.num_filters = num_filters
        self.num_classes = num_classes
        self.vocab = vocab

    def forward(self, x):
        # Reference forward() is `pass`; run the only defined layer.
        return embedding_lookup(x, self._table_padded, self.embedding_dim)


if __name__ == "__main__":
    # Small deterministic example consistent with the module:
    # batch=2, seq=8 token ids from a vocab of 32, embedding_dim=32.
    embedding_dim = 32
    num_words = 32
    num_filters = 16   # unused (no conv layers defined in reference)
    num_classes = 2    # unused
    vocab = None       # unused

    key = jax.random.PRNGKey(0)
    k_ids, k_emb = jax.random.split(key)

    x = jax.random.randint(k_ids, (2, 8), minval=0, maxval=num_words,
                           dtype=jnp.int32)

    model = SenCNNPallas(embedding_dim, num_words, num_filters, num_classes,
                         vocab, key=k_emb)

    ref = jnp.take(model.embedding_weight, x, axis=0)

    # Default path (small vocab -> VMEM-resident table, one-hot MXU gather).
    out = jax.block_until_ready(model.forward(x))
    assert out.shape == (2, 8, embedding_dim), out.shape
    assert jnp.allclose(out, ref, atol=1e-6), "mismatch (VMEM-resident path)"

    # Also exercise the large-vocab DMA-gather path on the same inputs.
    out_dma = jax.block_until_ready(
        embedding_lookup(x, model._table_padded, model.embedding_dim,
                         force_dma=True)
    )
    assert jnp.allclose(out_dma, ref, atol=1e-6), "mismatch (DMA-gather path)"

    print("KERNEL_OK")
</pallas_src>

<mosaic_0001>
module attributes {stable_mosaic.version = 11 : i64} {
  func.func @_onehot_gather_kernel(%arg0: i32, %arg1: memref<8x1xi32, #tpu.memory_space<vmem>>, %arg2: memref<32x128xf32, #tpu.memory_space<vmem>>, %arg3: memref<8x128xf32, #tpu.memory_space<vmem>>) attributes {dimension_semantics = [#tpu.dimension_semantics<parallel>], iteration_bounds = array<i64: 2>, scalar_prefetch = 0 : i64, scratch_operands = 0 : i64, tpu.core_type = #tpu.core_type<tc>, window_params = [{transform_indices = @transform_0, window_bounds = array<i64: 8, 1>}, {pipeline_mode = #tpu.pipeline_mode<synchronous>, transform_indices = @transform_1, window_bounds = array<i64: 32, 128>}, {transform_indices = @transform_2, window_bounds = array<i64: 8, 128>}]} {
    %c0 = arith.constant 0 : index
    %c0_0 = arith.constant 0 : index
    %0 = vector.load %arg1[%c0, %c0_0] : memref<8x1xi32, #tpu.memory_space<vmem>>, vector<8x1xi32>
    %1 = tpu.iota {dimensions = array<i32: 1>} : vector<8x32xi32>
    %2 = vector.broadcast %0 : vector<8x1xi32> to vector<8x32xi32>
    %3 = arith.cmpi eq, %2, %1 : vector<8x32xi32>
    %4 = arith.extui %3 : vector<8x32xi1> to vector<8x32xi32>
    %5 = arith.sitofp %4 : vector<8x32xi32> to vector<8x32xf32>
    %c0_1 = arith.constant 0 : index
    %c0_2 = arith.constant 0 : index
    %6 = vector.load %arg2[%c0_1, %c0_2] : memref<32x128xf32, #tpu.memory_space<vmem>>, vector<32x128xf32>
    %cst = arith.constant dense<0.000000e+00> : vector<8x128xf32>
    %7 = tpu.matmul %5, %6, %cst {dimension_numbers = #tpu.dot_dimension_numbers<[1], [0], [0], [1], [0, 0, 1, 1], [], []>} : vector<8x32xf32>, vector<32x128xf32>, vector<8x128xf32> -> vector<8x128xf32>
    %c0_3 = arith.constant 0 : index
    %c0_4 = arith.constant 0 : index
    %8 = vector.load %arg3[%c0_3, %c0_4] : memref<8x128xf32, #tpu.memory_space<vmem>>, vector<8x128xf32>
    tpu.vector_store %arg3[%c0_3, %c0_4], %7 {strides = array<i32>} : memref<8x128xf32, #tpu.memory_space<vmem>>, vector<8x128xf32>,
    return
  }
  func.func @transform_0(%arg0: i32) -> (i32, i32) {
    %c0_i32 = arith.constant 0 : i32
    %c0_i32_0 = arith.constant 0 : i32
    return %arg0, %c0_i32 : i32, i32
  }
  func.func @transform_1(%arg0: i32) -> (i32, i32) {
    %c0_i32 = arith.constant 0 : i32
    %c0_i32_0 = arith.constant 0 : i32
    %c0_i32_1 = arith.constant 0 : i32
    return %c0_i32, %c0_i32_0 : i32, i32
  }
  func.func @transform_2(%arg0: i32) -> (i32, i32) {
    %c0_i32 = arith.constant 0 : i32
    %c0_i32_0 = arith.constant 0 : i32
    return %arg0, %c0_i32 : i32, i32
  }
}

</mosaic_0001>

<bundles_post_ra>
// kernel: tpu_custom_call.1
= control target key start
LH: loop header
LB: loop body
LE: loop exit
PB: predicated region body
PF: predicated region fallthrough
CT: control target
= control target key end

     0   :  { %7 = vsyncpa [#allocation3], 0  ;;  %s674_s0 = inlined_call_operand.vmem [shape: s32[16,1], index: 0, kind: input, shape index: {}]   ;;  %s675_s1 = inlined_call_operand.hbm [shape: f32[32,128], index: 1, kind: input, shape index: {}]   ;;  %s676_s2 = inlined_call_operand.hbm [shape: f32[16,128], index: 2, kind: output, shape index: {}]  }
   0x1   :  { %8 = vsyncpa [#allocation4], 0 }
   0x2   :  { %10 = vsyncpa [#allocation4 + $0x1], 0  ;;  %s539_s9 = smov 0   ;;  %s541_s10 = smov 0  }
   0x3   :  { %s543_s11 = smov 0   ;;  %s545_s12 = smov 0  }
   0x4 LB: > { %s560_s13 = sadd.s32 4294967295, %s514_s12   ;;  %s327_s14 = sadd.s32 4294967294, %s514_s12   ;;  %s514_s12 = sphi %s545_s12, %s692_s12   ;;  %s510_s11 = sphi %s543_s11, %s691_s11   ;;  %s506_s10 = sphi %s541_s10, %s690_s10   ;;  %s502_s9 = sphi %s539_s9, %s689_s9  }
   0x5   : > { %s564_s15 = sadd.s32 1, %s514_s12   ;;  %s70_s16 = sadd.s32 1, %s510_s11 }
   0x6   : > { %s67_s17 = ssub.s32 %s514_s12, %s564_s15  ;;  %p80_p0 = scmp.ne.s32.totalorder %s510_s11, %s506_s10 }
   0x7   : > { %p68_p1 = scmp.eq.s32.totalorder %s67_s17, 0  ;;  %p81_p2 = scmp.eq.s32.totalorder %s560_s13, 1 }
   0x8   : > { %p86_p3 = scmp.ne.s32.totalorder %s506_s10, %s502_s9  ;;  %p87_p4 = scmp.eq.s32.totalorder %s327_s14, 1 }
   0x9   : > { %s575_s18 = scalar_select %p68_p1, %s510_s11, %s70_s16  }
   0xa   : > { %p577_p5 = por %p81_p2, %p80_p0  ;;  %p581_p6 = por %p87_p4, %p86_p3 }
   0xb   : > { %p328_p7 = scmp.ge.s32.totalorder %s514_s12, 1  ;;  %p94_p8 = scmp.lt.s32.totalorder %s514_s12, 3 }
   0xc   : > { %s680_s19 = scalar_select %p577_p5, 1, 0 }
   0xd   : > { %s681_s20 = scalar_select %p581_p6, 1, 0 }
   0xe   : > { %p677_p9 = scmp.eq.s32.totalorder %s560_s13, 0  ;;  %p588_p10 = pnand %p328_p7, %p94_p8 }
   0xf   : > { %s516_s22 = smov [#allocation2]   ;;  %s420_s27 = scalar_lea.hbm %s675_s1, 512 }
  0x10   : > { %s682_s21 = scalar_select %p588_p10, 1, 0 }
  0x11   : > { %s106_s23 = sshll.u32 %s516_s22, 4  ;;  %p369_p11 = pneg %p588_p10  ;;  %s107_s23 = int_to_ptr.vmem [resolvable:$true] %s106_s23 }
  0x12   : > { %p421_p13 = scmp.ne.s32.totalorder %s675_s1, %s420_s27  ;;  %p427_p3 = scmp.lt.u32.totalorder %s420_s27, %s675_s1 }
  0x13   : > { %p596_p12 = pnand %p677_p9, %p369_p11 }
  0x15   : > { %p422_p0 = pneg %p596_p12 }
  0x17   : > { %p423_p1 = pnand %p422_p0, %p421_p13 }
  0x19   : > { %p424_p2 = pneg %p423_p1 }
  0x1b   : > { %p429_p4 = pnand %p427_p3, %p424_p2 }
  0x1d   : > { %432 = shalt.err (!%p429_p4)
}
  0x1e   : > { %s433_s4 = scalar_lea.vmem %s107_s23, 512  ;;  %p441_p9 = scmp.lt.s32.totalorder %s107_s23, %s107_s23 }
  0x1f   : > { %p434_p7 = scmp.ne.s32.totalorder %s107_s23, %s433_s4  ;;  %p442_p6 = scmp.lt.s32.totalorder %s433_s4, %s433_s4 }
  0x21   : > { %p436_p8 = pnand %p434_p7, %p422_p0  ;;  %p443_p5 = por %p442_p6, %p441_p9 }
  0x23   : > { %p437_p11 = pneg %p436_p8 }
  0x25   : > { %p444_p10 = pnand %p443_p5, %p437_p11 }
  0x27   : > { %447 = shalt.err (!%p444_p10)
}
  0x28   : > { %s517_s5 = smov 128   ;;  %s518_s6 = smov 8  }
  0x29   : > { %372 = dma.hbm_to_vmem [thread:$0]  (!%p596_p12), %s675_s1, 512, %s107_s23, [#allocation3], %s517_s5, %s517_s5, %s518_s6  }
  0x2a   : > { %p684_p13 = scmp.ne.s32.totalorder %s682_s21, 0 }
  0x2b   : > { %p685_p1 = scmp.eq.s32.totalorder (!%p684_p13), %s560_s13, 0 }
  0x2c   : > { %129 = sbr.rel (%p684_p13) target bundleno = 415 (0x19f), region = 28 }
  0x33   : > { %493 = dma.done.wait (%p685_p1), [#allocation3], 512   ;;  %p686_p0 = pmov %p685_p1 }
  0x34   : > { %p150_p5 = scmp.lt.s32.totalorder %s560_s13, 1  ;;  %v519_v0 = vmov 0   ;;  %v520_v1 = vmov 0.0|0.0   ;;  %v163_v3 = vld [vmem:[#allocation2] sm:$0xff]  ;;  %v164_v4 = vld [vmem:[#allocation2 + $0x8] sm:$0xff]  ;;  %v165_v6 = vld [vmem:[#allocation2 + $0x10] sm:$0xff]  ;;  %v155_v10 = vlaneseq }
  0x35   : > { %495 = vsyncadd (%p686_p0), [#allocation3], 4294966784  ;;  %419 = vset.pattern.permute.xlu0 %v519_v0  ;;  %357 = vmatprep.subr.bf16.mxu0 %v520_v1  ;;  %v358_v5 = vpack.c.bf16 %v164_v4, %v163_v3  ;;  %v166_v7 = vld [vmem:[#allocation2 + $0x18] sm:$0xff]  ;;  %vm521_vm0 = vmmov 0   ;;  %v522_v8 = vmov 0.0   ;;  %vm167_vm1 = vcmask 261120  }
  0x36   : > { %s151_s14 = scalar_select %p150_p5, %s560_s13, 1  ;;  %354 = vmatprep.mubr.msk.f32.mxu0 %vm521_vm0, %v522_v8  ;;  %v361_v9 = vpack.c.bf16 %v166_v7, %v165_v6  ;;  %v156_v11 = vand.u32 127, %v155_v10 }
  0x37   : > { %359 = vmatpush3.bf16.msra.mxu0 %v358_v5  ;;  %s147_s23 = sand.u32 1, %s506_s10   ;;  %s338_s27 = sshll.u32 %s560_s13, 7 }
  0x38   : > { %s334_s16 = sshll.u32 %s151_s14, 3  ;;  %360 = vmatprep.subr.bf16.mxu0 %v520_v1  ;;  %s333_s24 = sshll.u32 %s147_s23, 3 }
  0x39   : > { %s153_s21 = scalar_lea.vmem %s674_s0, %s334_s16  ;;  %s149_s25 = scalar_lea.vmem [#allocation5], %s333_s24 }
  0x3a   : > { %v154_v2 = vld [vmem:[%s153_s21] sm:$0xff]  ;;  %s256_s26 = sshll.u32 %s149_s25, 4  ;;  %s634_s30 = scalar_lea.hbm %s676_s2, %s338_s27  ;;  %s629_s26 = int_to_ptr.vmem [resolvable:$true] %s256_s26 }
  0x3b   : > { %158 = vperm.xlu0 %419, %v154_v2   ;;  %362 = vmatpush3.bf16.msra.mxu0 %v361_v9  ;;  %s243_s3 = scalar_lea.sflag [#allocation4], %s147_s23  ;;  %s448_s4 = scalar_lea.vmem %s629_s26, 128 }
  0x3c   : > { %p449_p6 = scmp.ne.s32.totalorder %s629_s26, %s448_s4  ;;  %p687_p9 = scmp.ne.s32.totalorder %s680_s19, 0 }
  0x3d   : > { %s523_s13 = smov [#allocation5]  }
  0x3e   : > { %p450_p10 = pnand %p449_p6, %p687_p9  ;;  %s452_s5 = sshll.u32 %s523_s13, 4  ;;  %s453_s5 = int_to_ptr.vmem [resolvable:$false] %s452_s5 }
  0x3f   : > { %s454_s6 = scalar_lea.vmem %s453_s5, 256  ;;  %p455_p2 = scmp.lt.s32.totalorder %s629_s26, %s453_s5 }
  0x40   : > { %p451_p12 = pneg %p450_p10  ;;  %p456_p3 = scmp.lt.s32.totalorder %s454_s6, %s448_s4 }
  0x42   : > { %p457_p4 = por %p456_p3, %p455_p2 }
  0x44   : > { %p458_p7 = pnand %p457_p4, %p451_p12 }
  0xba   : > { %v159_v12 = vpop.permute.xlu0 %158 }
  0xbb   : > { %vm160_vm2 = vcmp.eq.s32.totalorder %v159_v12, %v156_v11 }
  0xbc   : > { %v335_v13 = vsel %vm160_vm2, 1.0, %v522_v8 }
  0xbd   : > { %355 = vmatmul.mubr.msk.f32.vlgmr.msra.gmra.mrb[0].mxu0 %vm167_vm1, %v335_v13 }
 0x190   : > { %v237_v14 = vpop.f32.mrb[0].mxu0 }
 0x191   : > { %241 = vst [vmem:[%s149_s25] sm:$0xff] %v237_v14  ;;  %v356_v15 = vpop.f32.mrb[1].mxu0 }
 0x192   : > { %461 = shalt.err (!%p458_p7)
}
 0x193   : > { %s462_s7 = scalar_lea.hbm %s634_s30, 128  ;;  %s466_s16 = scalar_lea.hbm %s676_s2, 256 }
 0x194   : > { %p463_p8 = scmp.ne.s32.totalorder %s634_s30, %s462_s7  ;;  %p467_p1 = scmp.lt.u32.totalorder %s634_s30, %s676_s2 }
 0x195   : > { %p468_p0 = scmp.lt.u32.totalorder %s466_s16, %s462_s7  ;;  %p470_p6 = scmp.lt.u32.totalorder %s462_s7, %s634_s30 }
 0x196   : > { %p464_p11 = pnand %p463_p8, %p687_p9 }
 0x197   : > { %p469_p5 = por %p468_p0, %p467_p1 }
 0x198   : > { %p465_p13 = pneg %p464_p11 }
 0x199   : > { %p471_p10 = por %p470_p6, %p469_p5 }
 0x19b   : > { %p472_p12 = pnand %p471_p10, %p465_p13 }
 0x19d   : > { %475 = shalt.err (!%p472_p12)
}
 0x19e   : > { %367 = dma.vmem_to_hbm [thread:$0]  (%p687_p9), %s629_s26, 128, %s634_s30, %s243_s3  }
 0x19f PF: > { %p379_p2 = scmp.ge.s32.totalorder %s514_s12, 2  ;;  %s268_s21 = sand.u32 1, %s502_s9  }
 0x1a0   : > { %p688_p3 = scmp.ne.s32.totalorder %s681_s20, 0  ;;  %s269_s23 = scalar_lea.sflag [#allocation4], %s268_s21 }
 0x1a2   : > { %p374_p4 = pnand %p379_p2, %p688_p3 }
 0x1a4   : > { %497 = dma.done.wait (!%p374_p4), %s269_s23, 128  }
 0x1a5   : > { %499 = vsyncadd (!%p374_p4), %s269_s23, 4294967168  ;;  %p13_p7 = scmp.ge.s32.totalorder %s564_s15, 4   ;;  %s689_s9 = smov %s506_s10 }
 0x1a6   : > { %s690_s10 = smov %s510_s11  ;;  %s691_s11 = smov %s575_s18 }
 0x1a7   : > { %s692_s12 = smov %s564_s15  ;;  %15 = sbr.rel (!%p13_p7) target bundleno = 4 (0x4), region = 68 }
 0x1ae   :  { %274 = vsyncpa [#allocation3], 1 }
 0x1af   :  { %276 = vsyncpa [#allocation3 + $0x1], 1 }
 0x1b0   :  { %277 = vsyncpa [#allocation4], 1 }
 0x1b1   :  { %279 = vsyncpa [#allocation4 + $0x1], 1 }

</bundles_post_ra>
